<compile_context>
chip_gen: v7x
topology: tpu7x:2x2x1
jax: 0.10.0
libtpu: 0.0.40
codegen_flags: <defaults>
</compile_context>

<pallas_src>
import jax
import jax.numpy as jnp
import numpy as np
from jax.experimental import pallas as pl
from jax.experimental.pallas import tpu as pltpu

LANES = 512            # lane-dense last dim (multiple of 128) -> unmasked vst
MAX_BLOCK_ROWS = 1024  # (1024, 512) f32 tile = 2 MiB per buffer


def _round_up(x, m):
    return ((x + m - 1) // m) * m


def _h_sigmoid_kernel(x_ref, o_ref):
    x = x_ref[...]
    # h_sigmoid: relu6(x + 3) / 6  (multiply by reciprocal; cheaper than div)
    y = jnp.clip(x + 3.0, 0.0, 6.0) * (1.0 / 6.0)
    o_ref[...] = y.astype(o_ref.dtype)


def h_sigmoid(x, *, lanes=LANES, max_block_rows=MAX_BLOCK_ROWS):
    """Elementwise relu6(x + 3) / 6 for any input shape (Pallas TPU)."""
    orig_shape = x.shape
    n = x.size
    if n == 0:
        return x

    flat = x.reshape(-1)
    rows = pl.cdiv(n, lanes)

    # Sublane granularity by dtype: f32 -> 8, bf16/f16 -> 16, int8/fp8 -> 32.
    itemsize = jnp.dtype(x.dtype).itemsize
    sub = 8 * max(1, 4 // max(1, itemsize))

    # Block row count: multiple of the sublane granularity, capped.
    br = min(_round_up(max_block_rows, sub), _round_up(rows, sub))
    rows_p = _round_up(rows, br)

    pad = rows_p * lanes - n
    if pad:
        flat = jnp.pad(flat, (0, pad))
    x2 = flat.reshape(rows_p, lanes)

    out = pl.pallas_call(
        _h_sigmoid_kernel,
        out_shape=jax.ShapeDtypeStruct((rows_p, lanes), x.dtype),
        grid=(rows_p // br,),
        in_specs=[pl.BlockSpec((br, lanes), lambda i: (i, 0))],
        out_specs=pl.BlockSpec((br, lanes), lambda i: (i, 0)),
        compiler_params=pltpu.CompilerParams(
            # Tiles are independent -> allow megacore (v7x) to split the grid.
            dimension_semantics=("parallel",),
        ),
    )(x2)

    out_flat = out.reshape(-1)
    if pad:
        out_flat = out_flat[:n]
    return out_flat.reshape(orig_shape)


def h_sigmoid_reference(x):
    return jnp.clip(x + 3.0, 0.0, 6.0) / 6.0


if __name__ == "__main__":
    key = jax.random.PRNGKey(0)

    # Small NCHW tensor consistent with the module's typical use; values scaled
    # so both clip saturation branches are exercised.
    x = 4.0 * jax.random.normal(key, (2, 4, 16, 16), jnp.float32)
    y = jax.jit(h_sigmoid)(x)
    jax.block_until_ready(y)
    np.testing.assert_allclose(np.asarray(y),
                               np.asarray(h_sigmoid_reference(x)),
                               rtol=1e-6, atol=1e-6)

    # Shape that does not divide the tile evenly (pad + slice path).
    x2 = 4.0 * jax.random.normal(jax.random.PRNGKey(1), (3, 5, 7, 11),
                                 jnp.float32)
    y2 = jax.jit(h_sigmoid)(x2)
    jax.block_until_ready(y2)
    np.testing.assert_allclose(np.asarray(y2),
                               np.asarray(h_sigmoid_reference(x2)),
                               rtol=1e-6, atol=1e-6)

    # Larger tensor that exercises a multi-tile grid (2 grid steps).
    x3 = 4.0 * jax.random.normal(jax.random.PRNGKey(2), (8, 32, 64, 64),
                                 jnp.float32)
    y3 = jax.jit(h_sigmoid)(x3)
    jax.block_until_ready(y3)
    np.testing.assert_allclose(np.asarray(y3),
                               np.asarray(h_sigmoid_reference(x3)),
                               rtol=1e-6, atol=1e-6)

    # bf16 path (16-sublane block granularity).
    x4 = (4.0 * jax.random.normal(jax.random.PRNGKey(3), (2, 4, 16, 16),
                                  jnp.float32)).astype(jnp.bfloat16)
    y4 = jax.jit(h_sigmoid)(x4)
    jax.block_until_ready(y4)
    np.testing.assert_allclose(
        np.asarray(y4, dtype=np.float32),
        np.asarray(h_sigmoid_reference(x4), dtype=np.float32),
        rtol=2e-2, atol=2e-2)

    print("KERNEL_OK")
</pallas_src>

<mosaic_0001>
module attributes {stable_mosaic.version = 11 : i64} {
  func.func @_h_sigmoid_kernel(%arg0: i32, %arg1: memref<8x512xf32, #tpu.memory_space<vmem>>, %arg2: memref<8x512xf32, #tpu.memory_space<vmem>>) attributes {dimension_semantics = [#tpu.dimension_semantics<parallel>], iteration_bounds = array<i64: 1>, scalar_prefetch = 0 : i64, scratch_operands = 0 : i64, tpu.core_type = #tpu.core_type<tc>, window_params = [{transform_indices = @transform_0, window_bounds = array<i64: 8, 512>}, {transform_indices = @transform_1, window_bounds = array<i64: 8, 512>}]} {
    %c0 = arith.constant 0 : index
    %c0_0 = arith.constant 0 : index
    %0 = vector.load %arg1[%c0, %c0_0] : memref<8x512xf32, #tpu.memory_space<vmem>>, vector<8x512xf32>
    %cst = arith.constant 3.000000e+00 : f32
    %1 = vector.broadcast %cst : f32 to vector<8x512xf32>
    %2 = arith.addf %0, %1 : vector<8x512xf32>
    %cst_1 = arith.constant 0.000000e+00 : f32
    %cst_2 = arith.constant 6.000000e+00 : f32
    %3 = vector.broadcast %cst_1 : f32 to vector<8x512xf32>
    %4 = arith.maximumf %3, %2 : vector<8x512xf32>
    %5 = vector.broadcast %cst_2 : f32 to vector<8x512xf32>
    %6 = arith.minimumf %5, %4 : vector<8x512xf32>
    %cst_3 = arith.constant 0.166666672 : f32
    %7 = vector.broadcast %cst_3 : f32 to vector<8x512xf32>
    %8 = arith.mulf %6, %7 : vector<8x512xf32>
    %c0_4 = arith.constant 0 : index
    %c0_5 = arith.constant 0 : index
    %9 = vector.load %arg2[%c0_4, %c0_5] : memref<8x512xf32, #tpu.memory_space<vmem>>, vector<8x512xf32>
    tpu.vector_store %arg2[%c0_4, %c0_5], %8 {strides = array<i32>} : memref<8x512xf32, #tpu.memory_space<vmem>>, vector<8x512xf32>,
    return
  }
  func.func @transform_0(%arg0: i32) -> (i32, i32) {
    %c0_i32 = arith.constant 0 : i32
    %c0_i32_0 = arith.constant 0 : i32
    return %arg0, %c0_i32 : i32, i32
  }
  func.func @transform_1(%arg0: i32) -> (i32, i32) {
    %c0_i32 = arith.constant 0 : i32
    %c0_i32_0 = arith.constant 0 : i32
    return %arg0, %c0_i32 : i32, i32
  }
}

</mosaic_0001>

<bundles_post_ra>
// kernel: h_sigmoid.1
= control target key start
LH: loop header
LB: loop body
LE: loop exit
PB: predicated region body
PF: predicated region fallthrough
CT: control target
= control target key end

     0   :  { %s70_s0 = inlined_call_operand.vmem [shape: f32[8,512], index: 0, kind: input, shape index: {}]   ;;  %s71_s1 = inlined_call_operand.vmem [shape: f32[8,512], index: 1, kind: output, shape index: {}]  }
   0x1   :  { %v8_v0 = vld [vmem:[%s70_s0] sm:$0xff]  ;;  %v9_v1 = vld [vmem:[%s70_s0 + $0x8] sm:$0xff]  ;;  %v10_v2 = vld [vmem:[%s70_s0 + $0x10] sm:$0xff] }
   0x2   :  { %v12_v3 = vadd.f32 3.0, %v8_v0  ;;  %v13_v4 = vadd.f32 3.0, %v9_v1  ;;  %v14_v5 = vadd.f32 3.0, %v10_v2  ;;  %v11_v6 = vld [vmem:[%s70_s0 + $0x18] sm:$0xff] }
   0x3   :  { %v15_v7 = vadd.f32 3.0, %v11_v6 }
   0x4   :  { %v16_v8 = vmax.f32 %v12_v3, 0.0  ;;  %v17_v9 = vmax.f32 %v13_v4, 0.0  ;;  %v18_v10 = vmax.f32 %v14_v5, 0.0 }
   0x5   :  { %v19_v11 = vmax.f32 %v15_v7, 0.0 }
   0x6   :  { %v20_v12 = vmin.f32 %v16_v8, 6.0  ;;  %v21_v13 = vmin.f32 %v17_v9, 6.0  ;;  %v22_v14 = vmin.f32 %v18_v10, 6.0 }
   0x7   :  { %v23_v15 = vmin.f32 %v19_v11, 6.0 }
   0x8   :  { %v24_v16 = vmul.f32 0.16666667, %v20_v12  ;;  %v25_v17 = vmul.f32 0.16666667, %v21_v13  ;;  %v26_v18 = vmul.f32 0.16666667, %v22_v14 }
   0x9   :  { %v27_v19 = vmul.f32 0.16666667, %v23_v15 }
   0xa   :  { %28 = vst [vmem:[%s71_s1] sm:$0xff] %v24_v16  ;;  %29 = vst [vmem:[%s71_s1 + $0x8] sm:$0xff] %v25_v17 }
   0xb   :  { %30 = vst [vmem:[%s71_s1 + $0x10] sm:$0xff] %v26_v18  ;;  %31 = vst [vmem:[%s71_s1 + $0x18] sm:$0xff] %v27_v19 }

</bundles_post_ra>
